<compile_context>
chip_gen: v7x
topology: tpu7x:2x2x1
jax: 0.10.0
libtpu: 0.0.40
codegen_flags: <defaults>
</compile_context>

<pallas_src>
import functools

import jax
import jax.numpy as jnp
from jax.experimental import pallas as pl
from jax.experimental.pallas import tpu as pltpu

BN_EPS = 1e-5


# -----------------------------------------------------------------------------
# Pallas kernels
# -----------------------------------------------------------------------------
def _matmul_bn_kernel(a_ref, b_ref, scale_ref, bias_ref, o_ref, *, relu):
    """Tiled bf16 matmul, f32 accumulation into o_ref, BN scale/bias (+ReLU)."""
    @pl.when(pl.program_id(2) == 0)
    def _():
        o_ref[...] = jnp.zeros_like(o_ref)

    o_ref[...] += jnp.dot(a_ref[...], b_ref[...],
                          preferred_element_type=jnp.float32)

    @pl.when(pl.program_id(2) == pl.num_programs(2) - 1)
    def _():
        y = o_ref[...] * scale_ref[...] + bias_ref[...]
        if relu:
            y = jnp.maximum(y, 0.0)
        o_ref[...] = y


def _matmul_bn_res_kernel(a_ref, b_ref, scale_ref, bias_ref, id_ref, o_ref):
    """Same as above, but fuses the residual add + ReLU into the epilogue."""
    @pl.when(pl.program_id(2) == 0)
    def _():
        o_ref[...] = jnp.zeros_like(o_ref)

    o_ref[...] += jnp.dot(a_ref[...], b_ref[...],
                          preferred_element_type=jnp.float32)

    @pl.when(pl.program_id(2) == pl.num_programs(2) - 1)
    def _():
        y = o_ref[...] * scale_ref[...] + bias_ref[...] + id_ref[...]
        o_ref[...] = jnp.maximum(y, 0.0)


def _max9_kernel(x_ref, o_ref):
    # x: (9, rows_tile, C) stacked 3x3 window taps -> max over taps
    o_ref[...] = jnp.max(x_ref[...], axis=0)


def _gap_kernel(x_ref, o_ref, *, inv_n):
    # x: (B, hw_tile, C) -> accumulate scaled partial sums into (B, C)
    @pl.when(pl.program_id(0) == 0)
    def _():
        o_ref[...] = jnp.zeros_like(o_ref)
    o_ref[...] += jnp.sum(x_ref[...], axis=1) * inv_n


# -----------------------------------------------------------------------------
# Helpers
# -----------------------------------------------------------------------------
def _round_up(x, m):
    return ((x + m - 1) // m) * m


def _pick_tile(dim, cap, mult):
    t = min(dim, cap)
    t -= t % mult
    while dim % t:
        t -= mult
    return t


# -----------------------------------------------------------------------------
# Pallas wrappers
# -----------------------------------------------------------------------------
def matmul_bn_act(a, wmat, scale_p, bias_p, n_out, *, relu, identity=None):
    """(M,K)@(pK,pN) bf16 on the MXU; f32 acc; BN/ReLU (+residual) epilogue."""
    M, K = a.shape
    pK, pN = wmat.shape
    pM = _round_up(M, 8)

    a_p = a.astype(jnp.bfloat16)
    if pM != M or pK != K:
        a_p = jnp.pad(a_p, ((0, pM - M), (0, pK - K)))

    tm = _pick_tile(pM, 512, 8)       # large tm amortizes grid-step overhead
    tn = _pick_tile(pN, 256, 128)     # tn=256 lets wide-N layers shard 2 TCs
    tk = _pick_tile(pK, 1024, 128)    # enough K steps to hide DMA
    grid = (pM // tm, pN // tn, pK // tk)

    in_specs = [
        pl.BlockSpec((tm, tk), lambda i, j, k: (i, k)),
        pl.BlockSpec((tk, tn), lambda i, j, k: (k, j)),
        pl.BlockSpec((1, tn), lambda i, j, k: (0, j)),
        pl.BlockSpec((1, tn), lambda i, j, k: (0, j)),
    ]
    args = [a_p, wmat, scale_p, bias_p]

    # double-buffered bf16 A/B tiles + scale/bias + resident f32 output block
    vmem = 2 * ((tm * tk + tk * tn) * 2 + 2 * tn * 4) + tm * tn * 4

    if identity is None:
        kernel = functools.partial(_matmul_bn_kernel, relu=relu)
    else:
        kernel = _matmul_bn_res_kernel
        id_p = identity
        if pM != M or pN != n_out:
            id_p = jnp.pad(id_p, ((0, pM - M), (0, pN - n_out)))
        args.append(id_p)
        in_specs.append(pl.BlockSpec((tm, tn), lambda i, j, k: (i, j)))
        vmem += 2 * tm * tn * 4

    vmem_limit = min(max(2 * vmem, 32 * 1024 * 1024), 48 * 1024 * 1024)

    out = pl.pallas_call(
        kernel,
        out_shape=jax.ShapeDtypeStruct((pM, pN), jnp.float32),
        grid_spec=pltpu.PrefetchScalarGridSpec(
            num_scalar_prefetch=0,
            grid=grid,
            in_specs=in_specs,
            out_specs=pl.BlockSpec((tm, tn), lambda i, j, k: (i, j)),
        ),
        compiler_params=pltpu.CompilerParams(
            dimension_semantics=("parallel", "parallel", "arbitrary"),
            vmem_limit_bytes=vmem_limit,
        ),
    )(*args)
    return out[:M, :n_out]


def im2col(x, kh, kw, stride, pad):
    """NHWC (bf16) -> (B*Ho*Wo, kh*kw*C) patches; tap ordering = (i, j, cin)."""
    B, H, W, C = x.shape
    Ho = (H + 2 * pad - kh) // stride + 1
    Wo = (W + 2 * pad - kw) // stride + 1
    xp = jnp.pad(x, ((0, 0), (pad, pad), (pad, pad), (0, 0)))
    cols = [xp[:, i:i + stride * Ho:stride, j:j + stride * Wo:stride, :]
            for i in range(kh) for j in range(kw)]
    patches = jnp.concatenate(cols, axis=-1)          # (B, Ho, Wo, kh*kw*C)
    return patches.reshape(B * Ho * Wo, kh * kw * C), Ho, Wo


def conv_bn_act(x, p, stride, pad, relu, identity=None):
    """Conv2d(bias=False) + folded BatchNorm + ReLU [+ fused residual add]."""
    k, cout = p["k"], p["cout"]
    B = x.shape[0]
    patches, Ho, Wo = im2col(x.astype(jnp.bfloat16), k, k, stride, pad)
    idm = None
    if identity is not None:
        idm = identity.reshape(B * Ho * Wo, cout)
    out = matmul_bn_act(patches, p["wmat"], p["scale"], p["bias"], cout,
                        relu=relu, identity=idm)
    return out.reshape(B, Ho, Wo, cout)


def maxpool_3x3_s2_p1(x):
    B, H, W, C = x.shape
    Ho = (H + 2 - 3) // 2 + 1
    Wo = (W + 2 - 3) // 2 + 1
    xp = jnp.pad(x, ((0, 0), (1, 1), (1, 1), (0, 0)), constant_values=-jnp.inf)
    wins = [xp[:, i:i + 2 * Ho:2, j:j + 2 * Wo:2, :]
            for i in range(3) for j in range(3)]
    M = B * Ho * Wo
    stacked = jnp.stack(wins, axis=0).reshape(9, M, C)
    pM = _round_up(M, 8)
    if pM != M:
        stacked = jnp.pad(stacked, ((0, 0), (0, pM - M), (0, 0)))
    tr = _pick_tile(pM, 512, 8)
    out = pl.pallas_call(
        _max9_kernel,
        out_shape=jax.ShapeDtypeStruct((pM, C), x.dtype),
        grid=(pM // tr,),
        in_specs=[pl.BlockSpec((9, tr, C), lambda i: (0, i, 0))],
        out_specs=pl.BlockSpec((tr, C), lambda i: (i, 0)),
        compiler_params=pltpu.CompilerParams(
            dimension_semantics=("parallel",)),
    )(stacked)
    return out[:M].reshape(B, Ho, Wo, C)


def global_avg_pool(x):
    B, H, W, C = x.shape
    HW = H * W
    xr = x.reshape(B, HW, C)
    if HW > 512 and HW % 8 == 0:
        t = _pick_tile(HW, 512, 8)
    else:
        t = HW
    return pl.pallas_call(
        functools.partial(_gap_kernel, inv_n=1.0 / HW),
        out_shape=jax.ShapeDtypeStruct((B, C), x.dtype),
        grid=(HW // t,),
        in_specs=[pl.BlockSpec((B, t, C), lambda i: (0, i, 0))],
        out_specs=pl.BlockSpec((B, C), lambda i: (0, 0)),
        compiler_params=pltpu.CompilerParams(
            dimension_semantics=("arbitrary",)),
    )(xr)


# -----------------------------------------------------------------------------
# ResNet50 parameters (deterministic synthetic init, kernel-ready) and forward
# -----------------------------------------------------------------------------
def _conv_bn_params(key, cin, cout, k):
    fan_in = cin * k * k
    w = jax.random.normal(key, (cout, cin, k, k), jnp.float32) * jnp.sqrt(2.0 / fan_in)
    # PyTorch BatchNorm2d default init: gamma=1, beta=0, running_mean=0, running_var=1
    gamma = jnp.ones((cout,), jnp.float32)
    beta = jnp.zeros((cout,), jnp.float32)
    mean = jnp.zeros((cout,), jnp.float32)
    var = jnp.ones((cout,), jnp.float32)
    scale = gamma / jnp.sqrt(var + BN_EPS)
    bias = beta - mean * scale

    # Pre-transpose to (kh, kw, cin) x cout (matches im2col tap order), pre-pad
    # to MXU-friendly multiples, pre-cast to bf16, pre-fold BN scale/bias rows.
    K = k * k * cin
    pK, pN = _round_up(K, 128), _round_up(cout, 128)
    wmat = jnp.transpose(w, (2, 3, 1, 0)).reshape(K, cout)
    wmat = jnp.pad(wmat, ((0, pK - K), (0, pN - cout))).astype(jnp.bfloat16)
    scale_p = jnp.pad(scale, (0, pN - cout)).reshape(1, pN)
    bias_p = jnp.pad(bias, (0, pN - cout)).reshape(1, pN)
    return {"wmat": wmat, "scale": scale_p, "bias": bias_p,
            "k": k, "cin": cin, "cout": cout}


def init_resnet50_params(seed=42):
    key = jax.random.PRNGKey(seed)
    cnt = [0]

    def nk():
        cnt[0] += 1
        return jax.random.fold_in(key, cnt[0])

    params = {"stem": _conv_bn_params(nk(), 3, 64, 7), "stages": []}
    in_c = 64
    stage_cfg = [(64, 3, 1), (128, 4, 2), (256, 6, 2), (512, 3, 2)]  # ResNet50
    for width, n_blocks, stride in stage_cfg:
        blocks = []
        for b in range(n_blocks):
            s = stride if b == 0 else 1
            blk = {
                "stride": s,
                "conv1": _conv_bn_params(nk(), in_c, width, 1),
                "conv2": _conv_bn_params(nk(), width, width, 3),
                "conv3": _conv_bn_params(nk(), width, width * 4, 1),
            }
            if s != 1 or in_c != width * 4:
                blk["down"] = _conv_bn_params(nk(), in_c, width * 4, 1)
            blocks.append(blk)
            in_c = width * 4
        params["stages"].append(blocks)
    return params


def bottleneck(x, blk):
    if "down" in blk:
        identity = conv_bn_act(x, blk["down"], blk["stride"], 0, relu=False)
    else:
        identity = x
    out = conv_bn_act(x, blk["conv1"], 1, 0, relu=True)
    out = conv_bn_act(out, blk["conv2"], blk["stride"], 1, relu=True)
    # residual add + ReLU fused into the conv3 matmul epilogue
    out = conv_bn_act(out, blk["conv3"], 1, 0, relu=True, identity=identity)
    return out


def image_encoder_forward(x_nchw, params):
    """Equivalent of ImageEncoder.forward: x (B,3,H,W) -> features (B, 2048)."""
    x = jnp.transpose(x_nchw, (0, 2, 3, 1))            # NCHW -> NHWC
    x = conv_bn_act(x, params["stem"], 2, 3, relu=True)  # 7x7 s2 p3 + BN + ReLU
    x = maxpool_3x3_s2_p1(x)                           # 3x3 maxpool s2 p1
    for stage in params["stages"]:
        for blk in stage:
            x = bottleneck(x, blk)
    return global_avg_pool(x)                          # (B, 2048)


if __name__ == "__main__":
    params = init_resnet50_params(42)
    x = jax.random.normal(jax.random.PRNGKey(0), (2, 3, 32, 32), jnp.float32)
    feats = image_encoder_forward(x, params)
    jax.block_until_ready(feats)
    assert feats.shape == (2, 2048), feats.shape
    assert feats.dtype == jnp.float32
    assert bool(jnp.all(jnp.isfinite(feats)))
    print("KERNEL_OK")
</pallas_src>

<mosaic_0001>
module attributes {stable_mosaic.version = 11 : i64} {
  func.func @_matmul_bn_kernel(%arg0: i32, %arg1: i32, %arg2: i32, %arg3: memref<512x256xbf16, #tpu.memory_space<vmem>>, %arg4: memref<256x128xbf16, #tpu.memory_space<vmem>>, %arg5: memref<1x128xf32, #tpu.memory_space<vmem>>, %arg6: memref<1x128xf32, #tpu.memory_space<vmem>>, %arg7: memref<512x128xf32, #tpu.memory_space<vmem>>) attributes {dimension_semantics = [#tpu.dimension_semantics<parallel>, #tpu.dimension_semantics<parallel>, #tpu.dimension_semantics<arbitrary>], iteration_bounds = array<i64: 1, 1, 1>, scalar_prefetch = 0 : i64, scratch_operands = 0 : i64, tpu.core_type = #tpu.core_type<tc>, window_params = [{transform_indices = @transform_0, window_bounds = array<i64: 512, 256>}, {transform_indices = @transform_1, window_bounds = array<i64: 256, 128>}, {transform_indices = @transform_2, window_bounds = array<i64: 1, 128>}, {transform_indices = @transform_3, window_bounds = array<i64: 1, 128>}, {transform_indices = @transform_4, window_bounds = array<i64: 512, 128>}]} {
    %c0_i32 = arith.constant 0 : i32
    %0 = arith.cmpi eq, %arg2, %c0_i32 : i32
    %1 = arith.extui %0 : i1 to i32
    %c0_i32_0 = arith.constant 0 : i32
    %2 = arith.cmpi ne, %1, %c0_i32_0 : i32
    scf.if %2 {
      %cst_10 = arith.constant 0.000000e+00 : f32
      %12 = vector.broadcast %cst_10 : f32 to vector<512x128xf32>
      %c0_11 = arith.constant 0 : index
      %c0_12 = arith.constant 0 : index
      %13 = vector.load %arg7[%c0_11, %c0_12] : memref<512x128xf32, #tpu.memory_space<vmem>>, vector<512x128xf32>
      tpu.vector_store %arg7[%c0_11, %c0_12], %12 {strides = array<i32>} : memref<512x128xf32, #tpu.memory_space<vmem>>, vector<512x128xf32>,
    } else {
    }
    %c0 = arith.constant 0 : index
    %c0_1 = arith.constant 0 : index
    %3 = vector.load %arg7[%c0, %c0_1] : memref<512x128xf32, #tpu.memory_space<vmem>>, vector<512x128xf32>
    %c0_2 = arith.constant 0 : index
    %c0_3 = arith.constant 0 : index
    %4 = vector.load %arg3[%c0_2, %c0_3] : memref<512x256xbf16, #tpu.memory_space<vmem>>, vector<512x256xbf16>
    %c0_4 = arith.constant 0 : index
    %c0_5 = arith.constant 0 : index
    %5 = vector.load %arg4[%c0_4, %c0_5] : memref<256x128xbf16, #tpu.memory_space<vmem>>, vector<256x128xbf16>
    %cst = arith.constant dense<0.000000e+00> : vector<512x128xf32>
    %6 = tpu.matmul %4, %5, %cst {dimension_numbers = #tpu.dot_dimension_numbers<[1], [0], [0], [1], [0, 0, 1, 1], [], []>} : vector<512x256xbf16>, vector<256x128xbf16>, vector<512x128xf32> -> vector<512x128xf32>
    %7 = arith.addf %3, %6 : vector<512x128xf32>
    %c0_6 = arith.constant 0 : index
    %c0_7 = arith.constant 0 : index
    %8 = vector.load %arg7[%c0_6, %c0_7] : memref<512x128xf32, #tpu.memory_space<vmem>>, vector<512x128xf32>
    tpu.vector_store %arg7[%c0_6, %c0_7], %7 {strides = array<i32>} : memref<512x128xf32, #tpu.memory_space<vmem>>, vector<512x128xf32>,
    %c0_i32_8 = arith.constant 0 : i32
    %9 = arith.cmpi eq, %arg2, %c0_i32_8 : i32
    %10 = arith.extui %9 : i1 to i32
    %c0_i32_9 = arith.constant 0 : i32
    %11 = arith.cmpi ne, %10, %c0_i32_9 : i32
    scf.if %11 {
      %c0_10 = arith.constant 0 : index
      %c0_11 = arith.constant 0 : index
      %12 = vector.load %arg7[%c0_10, %c0_11] : memref<512x128xf32, #tpu.memory_space<vmem>>, vector<512x128xf32>
      %c0_12 = arith.constant 0 : index
      %c0_13 = arith.constant 0 : index
      %13 = vector.load %arg5[%c0_12, %c0_13] : memref<1x128xf32, #tpu.memory_space<vmem>>, vector<1x128xf32>
      %14 = vector.broadcast %13 : vector<1x128xf32> to vector<512x128xf32>
      %15 = arith.mulf %12, %14 : vector<512x128xf32>
      %c0_14 = arith.constant 0 : index
      %c0_15 = arith.constant 0 : index
      %16 = vector.load %arg6[%c0_14, %c0_15] : memref<1x128xf32, #tpu.memory_space<vmem>>, vector<1x128xf32>
      %17 = vector.broadcast %16 : vector<1x128xf32> to vector<512x128xf32>
      %18 = arith.addf %15, %17 : vector<512x128xf32>
      %cst_16 = arith.constant 0.000000e+00 : f32
      %19 = vector.broadcast %cst_16 : f32 to vector<512x128xf32>
      %20 = arith.maximumf %18, %19 : vector<512x128xf32>
      %c0_17 = arith.constant 0 : index
      %c0_18 = arith.constant 0 : index
      %21 = vector.load %arg7[%c0_17, %c0_18] : memref<512x128xf32, #tpu.memory_space<vmem>>, vector<512x128xf32>
      tpu.vector_store %arg7[%c0_17, %c0_18], %20 {strides = array<i32>} : memref<512x128xf32, #tpu.memory_space<vmem>>, vector<512x128xf32>,
    } else {
    }
    return
  }
  func.func @transform_0(%arg0: i32, %arg1: i32, %arg2: i32) -> (i32, i32) {
    %c0_i32 = arith.constant 0 : i32
    return %arg0, %arg2 : i32, i32
  }
  func.func @transform_1(%arg0: i32, %arg1: i32, %arg2: i32) -> (i32, i32) {
    %c0_i32 = arith.constant 0 : i32
    return %arg2, %arg1 : i32, i32
  }
  func.func @transform_2(%arg0: i32, %arg1: i32, %arg2: i32) -> (i32, i32) {
    %c0_i32 = arith.constant 0 : i32
    %c0_i32_0 = arith.constant 0 : i32
    return %c0_i32, %arg1 : i32, i32
  }
  func.func @transform_3(%arg0: i32, %arg1: i32, %arg2: i32) -> (i32, i32) {
    %c0_i32 = arith.constant 0 : i32
    %c0_i32_0 = arith.constant 0 : i32
    return %c0_i32, %arg1 : i32, i32
  }
  func.func @transform_4(%arg0: i32, %arg1: i32, %arg2: i32) -> (i32, i32) {
    %c0_i32 = arith.constant 0 : i32
    return %arg0, %arg1 : i32, i32
  }
}

</mosaic_0001>

<bundles_post_ra>
// kernel: tpu_custom_call.1
= control target key start
LH: loop header
LB: loop body
LE: loop exit
PB: predicated region body
PF: predicated region fallthrough
CT: control target
= control target key end

     0   :  { %9 = vsyncpa [#allocation3], 0  ;;  %s2015_s0 = inlined_call_operand.hbm [shape: bf16[512,256], index: 0, kind: input, shape index: {}]   ;;  %s2016_s1 = inlined_call_operand.hbm [shape: bf16[256,128], index: 1, kind: input, shape index: {}]   ;;  %s2017_s2 = inlined_call_operand.vmem [shape: f32[1,128], index: 2, kind: input, shape index: {}]   ;;  %s2018_s3 = inlined_call_operand.vmem [shape: f32[1,128], index: 3, kind: input, shape index: {}]   ;;  %s2019_s4 = inlined_call_operand.hbm [shape: f32[512,128], index: 4, kind: output, shape index: {}]  }
   0x1   :  { %10 = vsyncpa [#allocation6], 0 }
   0x2   :  { %11 = vsyncpa [#allocation4], 0  ;;  %s1770_s15 = smov [#allocation2]   ;;  %s1698_s19 = scalar_lea.hbm %s2015_s0, 8192 }
   0x3   :  { %s17_s16 = sshll.u32 %s1770_s15, 4  ;;  %p1699_p0 = scmp.ne.s32.totalorder %s2015_s0, %s1698_s19  ;;  %s18_s16 = int_to_ptr.vmem [resolvable:$true] %s17_s16 }
   0x4   :  { %p1702_p1 = scmp.lt.u32.totalorder %s1698_s19, %s2015_s0 }
   0x6   :  { %p1704_p2 = pnand %p1702_p1, %p1699_p0 }
   0x8   :  { %1707 = shalt.err (!%p1704_p2)
}
   0x9   :  { %s1708_s24 = scalar_lea.vmem %s18_s16, 8192  ;;  %p1713_p4 = scmp.lt.s32.totalorder %s18_s16, %s18_s16 }
   0xa   :  { %p1709_p3 = scmp.ne.s32.totalorder %s18_s16, %s1708_s24  ;;  %p1714_p5 = scmp.lt.s32.totalorder %s1708_s24, %s1708_s24 }
   0xc   :  { %p1715_p6 = por %p1714_p5, %p1713_p4 }
   0xe   :  { %p1716_p7 = pnand %p1715_p6, %p1709_p3 }
  0x10   :  { %1719 = shalt.err (!%p1716_p7)
}
  0x11   :  { %s1771_s25 = smov 128   ;;  %s1772_s26 = smov 8  }
  0x12   :  { %23 = dma.hbm_to_vmem [thread:$0]  %s2015_s0, 8192, %s18_s16, [#allocation3], %s1771_s25, %s1771_s25, %s1772_s26  }
  0x13   :  { %s1773_s29 = smov [#allocation5]   ;;  %s1720_s7 = scalar_lea.hbm %s2016_s1, 2048 }
  0x14   :  { %s29_s30 = sshll.u32 %s1773_s29, 4  ;;  %p1721_p8 = scmp.ne.s32.totalorder %s2016_s1, %s1720_s7  ;;  %s30_s30 = int_to_ptr.vmem [resolvable:$true] %s29_s30 }
  0x15   :  { %p1724_p9 = scmp.lt.u32.totalorder %s1720_s7, %s2016_s1 }
  0x17   :  { %p1726_p10 = pnand %p1724_p9, %p1721_p8 }
  0x19   :  { %1729 = shalt.err (!%p1726_p10)
}
  0x1a   :  { %s1730_s12 = scalar_lea.vmem %s30_s30, 2048  ;;  %p1735_p12 = scmp.lt.s32.totalorder %s30_s30, %s30_s30 }
  0x1b   :  { %p1731_p11 = scmp.ne.s32.totalorder %s30_s30, %s1730_s12  ;;  %p1736_p13 = scmp.lt.s32.totalorder %s1730_s12, %s1730_s12 }
  0x1d   :  { %p1737_p0 = por %p1736_p13, %p1735_p12 }
  0x1f   :  { %p1738_p1 = pnand %p1737_p0, %p1731_p11 }
  0x21   :  { %1741 = shalt.err (!%p1738_p1)
}
  0x22   :  { %s1774_s0 = smov 64   ;;  %s1775_s13 = smov 4  }
  0x23   :  { %35 = dma.hbm_to_vmem [thread:$0]  %s2016_s1, 2048, %s30_s30, [#allocation6], %s1774_s0, %s1774_s0, %s1775_s13  }
  0x24   :  { %1764 = dma.done.wait [#allocation3], 8192  }
  0x25   :  { %1765 = vsyncadd [#allocation3], 4294959104 }
  0x26   :  { %1766 = dma.done.wait [#allocation6], 2048  }
  0x27   :  { %1767 = vsyncadd [#allocation6], 4294965248  ;;  %v1776_v0 = vmov 0   ;;  %v1586_v1 = vld [vmem:[#allocation5] sm:$0xff]   ;;  %v1587_v2 = vld [vmem:[#allocation5 + $0x8] sm:$0xff]  }
  0x28   :  { %691 = vmatprep.subr.bf16.mxu0 %v1776_v0  ;;  %1545 = vmatprep.subr.bf16.mxu1 %v1776_v0  ;;  %v1588_v3 = vld [vmem:[#allocation5 + $0x10] sm:$0xff]   ;;  %v1589_v4 = vld [vmem:[#allocation5 + $0x18] sm:$0xff]   ;;  %v1590_v5 = vld [vmem:[#allocation5 + $0x20] sm:$0xff]  }
  0x29   :  { %692 = vmatpush1.bf16.msra.mxu0 %v1586_v1  ;;  %1561 = vmatpush1.bf16.msra.mxu1 %v1586_v1  ;;  %v1604_v6 = vld [vmem:[#allocation2 + $0x4] ss:$8 sps:$4 sm:$0xff]   ;;  %v1592_v9 = vld [vmem:[#allocation5 + $0x30] sm:$0xff]   ;;  %v1593_v10 = vld [vmem:[#allocation5 + $0x38] sm:$0xff]  }
  0x2a   :  { %693 = vmatprep.subr.bf16.mxu0 %v1776_v0  ;;  %1546 = vmatprep.subr.bf16.mxu1 %v1776_v0  ;;  %v1591_v7 = vld [vmem:[#allocation5 + $0x28] sm:$0xff]   ;;  %v1594_v11 = vld [vmem:[#allocation5 + $0x40] sm:$0xff]   ;;  %v1596_v13 = vld [vmem:[#allocation5 + $0x50] sm:$0xff]  }
  0x2b   :  { %v1607_v8 = vld [vmem:[#allocation2 + $0x104] ss:$8 sps:$4 sm:$0xff]   ;;  %723 = vmatprep.mubr.bf16.mxu0 %v1604_v6  ;;  %v1597_v14 = vld [vmem:[#allocation5 + $0x58] sm:$0xff]   ;;  %v1600_v17 = vld [vmem:[#allocation5 + $0x70] sm:$0xff]  }
  0x2c   :  { %851 = vmatprep.mubr.bf16.mxu1 %v1607_v8  ;;  %v1595_v12 = vld [vmem:[#allocation5 + $0x48] sm:$0xff]   ;;  %v1598_v15 = vld [vmem:[#allocation5 + $0x60] sm:$0xff]   ;;  %v1601_v18 = vld [vmem:[#allocation5 + $0x78] sm:$0xff]  }
  0x2d   :  { %694 = vmatpush1.bf16.msra.mxu0 %v1587_v2  ;;  %1562 = vmatpush1.bf16.msra.mxu1 %v1587_v2  ;;  %v1599_v16 = vld [vmem:[#allocation5 + $0x68] sm:$0xff]   ;;  %v1608_v21 = vld [vmem:[#allocation2 + $0x14] ss:$8 sps:$4 sm:$0xff]   ;;  %v1612_v23 = vld [vmem:[#allocation2 + $0x10] ss:$8 sps:$4 sm:$0xff]  }
  0x2e   :  { %695 = vmatprep.subr.bf16.mxu0 %v1776_v0  ;;  %1547 = vmatprep.subr.bf16.mxu1 %v1776_v0  ;;  %v1602_v19 = vld [vmem:[#allocation2] ss:$8 sps:$4 sm:$0xff]   ;;  %v1610_v22 = vld [vmem:[#allocation2 + $0x114] ss:$8 sps:$4 sm:$0xff]   ;;  %v1613_v24 = vld [vmem:[#allocation2 + $0x110] ss:$8 sps:$4 sm:$0xff]  }
  0x2f   :  { %v1605_v20 = vld [vmem:[#allocation2 + $0x100] ss:$8 sps:$4 sm:$0xff]   ;;  %v1614_v25 = vld [vmem:[#allocation2 + $0x24] ss:$8 sps:$4 sm:$0xff]   ;;  %v1620_v29 = vld [vmem:[#allocation2 + $0x34] ss:$8 sps:$4 sm:$0xff]  }
  0x30   :  { %v1616_v26 = vld [vmem:[#allocation2 + $0x124] ss:$8 sps:$4 sm:$0xff]   ;;  %v1618_v27 = vld [vmem:[#allocation2 + $0x20] ss:$8 sps:$4 sm:$0xff]   ;;  %v1622_v30 = vld [vmem:[#allocation2 + $0x134] ss:$8 sps:$4 sm:$0xff]  }
  0x31   :  { %696 = vmatpush1.bf16.msra.mxu0 %v1588_v3  ;;  %1563 = vmatpush1.bf16.msra.mxu1 %v1588_v3  ;;  %v1619_v28 = vld [vmem:[#allocation2 + $0x120] ss:$8 sps:$4 sm:$0xff]   ;;  %v1624_v31 = vld [vmem:[#allocation2 + $0x30] ss:$8 sps:$4 sm:$0xff]   ;;  %v1626_v33 = vld [vmem:[#allocation2 + $0x44] ss:$8 sps:$4 sm:$0xff]  }
  0x32   :  { %697 = vmatprep.subr.bf16.mxu0 %v1776_v0  ;;  %1548 = vmatprep.subr.bf16.mxu1 %v1776_v0  ;;  %v1625_v32 = vld [vmem:[#allocation2 + $0x130] ss:$8 sps:$4 sm:$0xff]   ;;  %v1628_v34 = vld [vmem:[#allocation2 + $0x144] ss:$8 sps:$4 sm:$0xff]   ;;  %v1630_v35 = vld [vmem:[#allocation2 + $0x40] ss:$8 sps:$4 sm:$0xff]  }
  0x33   :  { %v1631_v36 = vld [vmem:[#allocation2 + $0x140] ss:$8 sps:$4 sm:$0xff]   ;;  %v1632_v37 = vld [vmem:[#allocation2 + $0x54] ss:$8 sps:$4 sm:$0xff]   ;;  %v1636_v39 = vld [vmem:[#allocation2 + $0x50] ss:$8 sps:$4 sm:$0xff]  }
  0x34   :  { %v1634_v38 = vld [vmem:[#allocation2 + $0x154] ss:$8 sps:$4 sm:$0xff]   ;;  %v1637_v40 = vld [vmem:[#allocation2 + $0x150] ss:$8 sps:$4 sm:$0xff]   ;;  %v1638_v41 = vld [vmem:[#allocation2 + $0x64] ss:$8 sps:$4 sm:$0xff]  }
  0x35   :  { %698 = vmatpush1.bf16.msra.mxu0 %v1589_v4  ;;  %1564 = vmatpush1.bf16.msra.mxu1 %v1589_v4  ;;  %v1640_v42 = vld [vmem:[#allocation2 + $0x164] ss:$8 sps:$4 sm:$0xff]   ;;  %v1642_v43 = vld [vmem:[#allocation2 + $0x60] ss:$8 sps:$4 sm:$0xff]   ;;  %v1644_v45 = vld [vmem:[#allocation2 + $0x74] ss:$8 sps:$4 sm:$0xff]  }
  0x36   :  { %699 = vmatprep.subr.bf16.mxu0 %v1776_v0  ;;  %1549 = vmatprep.subr.bf16.mxu1 %v1776_v0  ;;  %v1643_v44 = vld [vmem:[#allocation2 + $0x160] ss:$8 sps:$4 sm:$0xff]   ;;  %v1646_v46 = vld [vmem:[#allocation2 + $0x174] ss:$8 sps:$4 sm:$0xff]   ;;  %v1648_v47 = vld [vmem:[#allocation2 + $0x70] ss:$8 sps:$4 sm:$0xff]  }
  0x37   :  { %v1649_v48 = vld [vmem:[#allocation2 + $0x170] ss:$8 sps:$4 sm:$0xff]   ;;  %v1650_v49 = vld [vmem:[#allocation2 + $0x84] ss:$8 sps:$4 sm:$0xff]   ;;  %v1654_v51 = vld [vmem:[#allocation2 + $0x80] ss:$8 sps:$4 sm:$0xff]  }
  0x38   :  { %v1652_v50 = vld [vmem:[#allocation2 + $0x184] ss:$8 sps:$4 sm:$0xff]   ;;  %v1655_v52 = vld [vmem:[#allocation2 + $0x180] ss:$8 sps:$4 sm:$0xff]   ;;  %v1656_v53 = vld [vmem:[#allocation2 + $0x94] ss:$8 sps:$4 sm:$0xff]  }
  0x39   :  { %700 = vmatpush1.bf16.msra.mxu0 %v1590_v5  ;;  %1565 = vmatpush1.bf16.msra.mxu1 %v1590_v5  ;;  %v1658_v54 = vld [vmem:[#allocation2 + $0x194] ss:$8 sps:$4 sm:$0xff]   ;;  %v1660_v55 = vld [vmem:[#allocation2 + $0x90] ss:$8 sps:$4 sm:$0xff]   ;;  %v1662_v57 = vld [vmem:[#allocation2 + $0xa4] ss:$8 sps:$4 sm:$0xff]  }
  0x3a   :  { %701 = vmatprep.subr.bf16.mxu0 %v1776_v0  ;;  %1550 = vmatprep.subr.bf16.mxu1 %v1776_v0  ;;  %v1661_v56 = vld [vmem:[#allocation2 + $0x190] ss:$8 sps:$4 sm:$0xff]   ;;  %v1664_v58 = vld [vmem:[#allocation2 + $0x1a4] ss:$8 sps:$4 sm:$0xff]   ;;  %v1666_v59 = vld [vmem:[#allocation2 + $0xa0] ss:$8 sps:$4 sm:$0xff]  }
  0x3b   :  { %v1667_v60 = vld [vmem:[#allocation2 + $0x1a0] ss:$8 sps:$4 sm:$0xff]   ;;  %v1668_v61 = vld [vmem:[#allocation2 + $0xb4] ss:$8 sps:$4 sm:$0xff]   ;;  %v1672_v63 = vld [vmem:[#allocation2 + $0xb0] ss:$8 sps:$4 sm:$0xff]  }
  0x3c   :  { %v1670_v62 = vld [vmem:[#allocation2 + $0x1b4] ss:$8 sps:$4 sm:$0xff]   ;;  %v1674_v1 = vld [vmem:[#allocation2 + $0xc4] ss:$8 sps:$4 sm:$0xff]   ;;  %v1678_v3 = vld [vmem:[#allocation2 + $0xc0] ss:$8 sps:$4 sm:$0xff]  }
  0x3d   :  { %702 = vmatpush1.bf16.msra.mxu0 %v1591_v7  ;;  %1566 = vmatpush1.bf16.msra.mxu1 %v1591_v7  ;;  %v1676_v2 = vld [vmem:[#allocation2 + $0x1c4] ss:$8 sps:$4 sm:$0xff]   ;;  %v1679_v4 = vld [vmem:[#allocation2 + $0x1c0] ss:$8 sps:$4 sm:$0xff]   ;;  %v1680_v5 = vld [vmem:[#allocation2 + $0xd4] ss:$8 sps:$4 sm:$0xff]  }
  0x3e   :  { %703 = vmatprep.subr.bf16.mxu0 %v1776_v0  ;;  %1551 = vmatprep.subr.bf16.mxu1 %v1776_v0  ;;  %v1682_v6 = vld [vmem:[#allocation2 + $0x1d4] ss:$8 sps:$4 sm:$0xff]   ;;  %v1684_v7 = vld [vmem:[#allocation2 + $0xd0] ss:$8 sps:$4 sm:$0xff]  }
  0x3f   :  { %v1685_v8 = vld [vmem:[#allocation2 + $0x1d0] ss:$8 sps:$4 sm:$0xff]  }
  0x41   :  { %704 = vmatpush1.bf16.msra.mxu0 %v1592_v9  ;;  %1567 = vmatpush1.bf16.msra.mxu1 %v1592_v9  ;;  %v1686_v9 = vld [vmem:[#allocation2 + $0xe4] ss:$8 sps:$4 sm:$0xff]  }
  0x42   :  { %705 = vmatprep.subr.bf16.mxu0 %v1776_v0  ;;  %1552 = vmatprep.subr.bf16.mxu1 %v1776_v0 }
  0x45   :  { %706 = vmatpush1.bf16.msra.mxu0 %v1593_v10  ;;  %1568 = vmatpush1.bf16.msra.mxu1 %v1593_v10  ;;  %v1688_v10 = vld [vmem:[#allocation2 + $0x1e4] ss:$8 sps:$4 sm:$0xff]  }
  0x46   :  { %707 = vmatprep.subr.bf16.mxu0 %v1776_v0  ;;  %1553 = vmatprep.subr.bf16.mxu1 %v1776_v0 }
  0x49   :  { %708 = vmatpush1.bf16.msra.mxu0 %v1594_v11  ;;  %1569 = vmatpush1.bf16.msra.mxu1 %v1594_v11  ;;  %v1690_v11 = vld [vmem:[#allocation2 + $0xe0] ss:$8 sps:$4 sm:$0xff]  }
  0x4a   :  { %709 = vmatprep.subr.bf16.mxu0 %v1776_v0  ;;  %1554 = vmatprep.subr.bf16.mxu1 %v1776_v0 }
  0x4d   :  { %710 = vmatpush1.bf16.msra.mxu0 %v1595_v12  ;;  %1570 = vmatpush1.bf16.msra.mxu1 %v1595_v12  ;;  %v1691_v12 = vld [vmem:[#allocation2 + $0x1e0] ss:$8 sps:$4 sm:$0xff]  }
  0x4e   :  { %711 = vmatprep.subr.bf16.mxu0 %v1776_v0  ;;  %1555 = vmatprep.subr.bf16.mxu1 %v1776_v0 }
  0x51   :  { %712 = vmatpush1.bf16.msra.mxu0 %v1596_v13  ;;  %1571 = vmatpush1.bf16.msra.mxu1 %v1596_v13  ;;  %v1692_v13 = vld [vmem:[#allocation2 + $0xf4] ss:$8 sps:$4 sm:$0xff]  }
  0x52   :  { %713 = vmatprep.subr.bf16.mxu0 %v1776_v0  ;;  %1556 = vmatprep.subr.bf16.mxu1 %v1776_v0 }
  0x55   :  { %714 = vmatpush1.bf16.msra.mxu0 %v1597_v14  ;;  %1572 = vmatpush1.bf16.msra.mxu1 %v1597_v14  ;;  %v1694_v14 = vld [vmem:[#allocation2 + $0x1f4] ss:$8 sps:$4 sm:$0xff]  }
  0x56   :  { %715 = vmatprep.subr.bf16.mxu0 %v1776_v0  ;;  %1557 = vmatprep.subr.bf16.mxu1 %v1776_v0 }
  0x59   :  { %716 = vmatpush1.bf16.msra.mxu0 %v1598_v15  ;;  %1573 = vmatpush1.bf16.msra.mxu1 %v1598_v15  ;;  %v1696_v15 = vld [vmem:[#allocation2 + $0xf0] ss:$8 sps:$4 sm:$0xff]  }
  0x5a   :  { %717 = vmatprep.subr.bf16.mxu0 %v1776_v0  ;;  %1558 = vmatprep.subr.bf16.mxu1 %v1776_v0 }
  0x5d   :  { %718 = vmatpush1.bf16.msra.mxu0 %v1599_v16  ;;  %1574 = vmatpush1.bf16.msra.mxu1 %v1599_v16  ;;  %v1697_v16 = vld [vmem:[#allocation2 + $0x1f0] ss:$8 sps:$4 sm:$0xff]  }
  0x5e   :  { %719 = vmatprep.subr.bf16.mxu0 %v1776_v0  ;;  %1559 = vmatprep.subr.bf16.mxu1 %v1776_v0 }
  0x61   :  { %720 = vmatpush1.bf16.msra.mxu0 %v1600_v17  ;;  %1575 = vmatpush1.bf16.msra.mxu1 %v1600_v17 }
  0x62   :  { %721 = vmatprep.subr.bf16.mxu0 %v1776_v0  ;;  %1560 = vmatprep.subr.bf16.mxu1 %v1776_v0  ;;  %v1673_v0 = vld [vmem:[#allocation2 + $0x1b0] ss:$8 sps:$4 sm:$0xff]  }
  0x65   :  { %722 = vmatpush1.bf16.msra.mxu0 %v1601_v18  ;;  %1576 = vmatpush1.bf16.msra.mxu1 %v1601_v18  ;;  %v1865_v18 = vld [vmem:[%s2017_s2] ss:$0 sm:$0xff]  ;;  %s1777_s2 = smov [#allocation7]  }
  0x68   :  { %724 = vmatmul.mubr.bf16.vlgmr.msra.gmra.mrb[0].mxu0 %v1602_v19  ;;  %852 = vmatmul.mubr.bf16.vlgmr.msra.gmra.mrb[0].mxu1 %v1605_v20 }
  0x69   :  { %731 = vmatprep.mubr.bf16.mxu0 %v1608_v21  ;;  %859 = vmatprep.mubr.bf16.mxu1 %v1610_v22  ;;  %v1870_v22 = vld [vmem:[%s2018_s3] ss:$0 sm:$0xff]  ;;  %s1450_s3 = sshll.u32 %s1777_s2, 4  ;;  %s1451_s3 = int_to_ptr.vmem [resolvable:$true] %s1450_s3 }
  0x6a   :  { %s1742_s19 = scalar_lea.vmem %s1451_s3, 8192  ;;  %p1747_p3 = scmp.lt.s32.totalorder %s1451_s3, %s1451_s3 }
  0x6b   :  { %p1743_p2 = scmp.ne.s32.totalorder %s1451_s3, %s1742_s19  ;;  %p1748_p4 = scmp.lt.s32.totalorder %s1742_s19, %s1742_s19 }
  0x6d   :  { %p1749_p5 = por %p1748_p4, %p1747_p3 }
  0x6f   :  { %p1750_p6 = pnand %p1749_p5, %p1743_p2 }
  0x70   :  { %732 = vmatmul.mubr.bf16.gmra.mrb[4].mxu0 %v1612_v23  ;;  %860 = vmatmul.mubr.bf16.gmra.mrb[4].mxu1 %v1613_v24 }
  0x71   :  { %739 = vmatprep.mubr.bf16.mxu0 %v1614_v25  ;;  %867 = vmatprep.mubr.bf16.mxu1 %v1616_v26 }
  0x78   :  { %740 = vmatmul.mubr.bf16.gmra.mrb[8].mxu0 %v1618_v27  ;;  %868 = vmatmul.mubr.bf16.gmra.mrb[8].mxu1 %v1619_v28 }
  0x79   :  { %747 = vmatprep.mubr.bf16.mxu0 %v1620_v29  ;;  %875 = vmatprep.mubr.bf16.mxu1 %v1622_v30 }
  0x80   :  { %748 = vmatmul.mubr.bf16.gmra.mrb[12].mxu0 %v1624_v31  ;;  %876 = vmatmul.mubr.bf16.gmra.mrb[12].mxu1 %v1625_v32 }
  0x81   :  { %755 = vmatprep.mubr.bf16.mxu0 %v1626_v33  ;;  %883 = vmatprep.mubr.bf16.mxu1 %v1628_v34 }
  0x88   :  { %756 = vmatmul.mubr.bf16.gmra.mrb[16].mxu0 %v1630_v35  ;;  %884 = vmatmul.mubr.bf16.gmra.mrb[16].mxu1 %v1631_v36 }
  0x89   :  { %763 = vmatprep.mubr.bf16.mxu0 %v1632_v37  ;;  %891 = vmatprep.mubr.bf16.mxu1 %v1634_v38 }
  0x90   :  { %764 = vmatmul.mubr.bf16.gmra.mrb[20].mxu0 %v1636_v39  ;;  %892 = vmatmul.mubr.bf16.gmra.mrb[20].mxu1 %v1637_v40 }
  0x91   :  { %771 = vmatprep.mubr.bf16.mxu0 %v1638_v41  ;;  %899 = vmatprep.mubr.bf16.mxu1 %v1640_v42 }
  0x98   :  { %772 = vmatmul.mubr.bf16.gmra.mrb[24].mxu0 %v1642_v43  ;;  %900 = vmatmul.mubr.bf16.gmra.mrb[24].mxu1 %v1643_v44 }
  0x99   :  { %779 = vmatprep.mubr.bf16.mxu0 %v1644_v45  ;;  %907 = vmatprep.mubr.bf16.mxu1 %v1646_v46 }
  0xa0   :  { %780 = vmatmul.mubr.bf16.gmra.mrb[28].mxu0 %v1648_v47  ;;  %908 = vmatmul.mubr.bf16.gmra.mrb[28].mxu1 %v1649_v48 }
  0xa1   :  { %787 = vmatprep.mubr.bf16.mxu0 %v1650_v49  ;;  %915 = vmatprep.mubr.bf16.mxu1 %v1652_v50 }
  0xa8   :  { %788 = vmatmul.mubr.bf16.gmra.mrb[32].mxu0 %v1654_v51  ;;  %916 = vmatmul.mubr.bf16.gmra.mrb[32].mxu1 %v1655_v52 }
  0xa9   :  { %795 = vmatprep.mubr.bf16.mxu0 %v1656_v53  ;;  %923 = vmatprep.mubr.bf16.mxu1 %v1658_v54 }
  0xb0   :  { %796 = vmatmul.mubr.bf16.gmra.mrb[36].mxu0 %v1660_v55  ;;  %924 = vmatmul.mubr.bf16.gmra.mrb[36].mxu1 %v1661_v56 }
  0xb1   :  { %803 = vmatprep.mubr.bf16.mxu0 %v1662_v57  ;;  %931 = vmatprep.mubr.bf16.mxu1 %v1664_v58 }
  0xb8   :  { %804 = vmatmul.mubr.bf16.gmra.mrb[40].mxu0 %v1666_v59  ;;  %932 = vmatmul.mubr.bf16.gmra.mrb[40].mxu1 %v1667_v60 }
  0xb9   :  { %811 = vmatprep.mubr.bf16.mxu0 %v1668_v61  ;;  %939 = vmatprep.mubr.bf16.mxu1 %v1670_v62 }
  0xc0   :  { %812 = vmatmul.mubr.bf16.gmra.mrb[44].mxu0 %v1672_v63  ;;  %940 = vmatmul.mubr.bf16.gmra.mrb[44].mxu1 %v1673_v0 }
  0xc1   :  { %819 = vmatprep.mubr.bf16.mxu0 %v1674_v1  ;;  %947 = vmatprep.mubr.bf16.mxu1 %v1676_v2 }
  0xc8   :  { %820 = vmatmul.mubr.bf16.gmra.mrb[48].mxu0 %v1678_v3  ;;  %948 = vmatmul.mubr.bf16.gmra.mrb[48].mxu1 %v1679_v4 }
  0xc9   :  { %827 = vmatprep.mubr.bf16.mxu0 %v1680_v5  ;;  %955 = vmatprep.mubr.bf16.mxu1 %v1682_v6 }
  0xd0   :  { %828 = vmatmul.mubr.bf16.gmra.mrb[52].mxu0 %v1684_v7  ;;  %956 = vmatmul.mubr.bf16.gmra.mrb[52].mxu1 %v1685_v8 }
  0xd1   :  { %835 = vmatprep.mubr.bf16.mxu0 %v1686_v9  ;;  %963 = vmatprep.mubr.bf16.mxu1 %v1688_v10 }
  0xd8   :  { %836 = vmatmul.mubr.bf16.gmra.mrb[56].mxu0 %v1690_v11  ;;  %964 = vmatmul.mubr.bf16.gmra.mrb[56].mxu1 %v1691_v12 }
  0xd9   :  { %843 = vmatprep.mubr.bf16.mxu0 %v1692_v13  ;;  %971 = vmatprep.mubr.bf16.mxu1 %v1694_v14 }
  0xe0   :  { %844 = vmatmul.mubr.bf16.gmra.mrb[60].mxu0 %v1696_v15  ;;  %972 = vmatmul.mubr.bf16.gmra.mrb[60].mxu1 %v1697_v16 }
 0x13b   :  { %v725_v17 = vpop.f32.mrb[0].mxu0  ;;  %v853_v19 = vpop.f32.mrb[0].mxu1 }
 0x13c   :  { %v727_v20 = vpop.f32.mrb[1].mxu0  ;;  %v855_v21 = vpop.f32.mrb[1].mxu1  ;;  %v1182_v25 = vmul.f32 %v1865_v18, %v725_v17  ;;  %v1214_v26 = vmul.f32 %v1865_v18, %v853_v19 }
 0x13d   :  { %v728_v23 = vpop.f32.mrb[2].mxu0  ;;  %v856_v24 = vpop.f32.mrb[2].mxu1 }
 0x13e   :  { %v730_v27 = vpop.f32.mrb[3].mxu0  ;;  %v858_v28 = vpop.f32.mrb[3].mxu1  ;;  %v1253_v29 = vadd.f32 %v1870_v22, %v1182_v25  ;;  %v1285_v30 = vadd.f32 %v1870_v22, %v1214_v26  ;;  %v1183_v31 = vmul.f32 %v1865_v18, %v728_v23  ;;  %v1215_v32 = vmul.f32 %v1865_v18, %v856_v24 }
 0x140   :  { %v1317_v33 = vmax.f32 %v1253_v29, 0.0  ;;  %v1349_v34 = vmax.f32 %v1285_v30, 0.0  ;;  %v1254_v35 = vadd.f32 %v1870_v22, %v1183_v31  ;;  %v1286_v36 = vadd.f32 %v1870_v22, %v1215_v32 }
 0x142   :  { %1381 = vst [vmem:[#allocation7] sm:$0xff] %v1317_v33  ;;  %1413 = vst [vmem:[#allocation7 + $0x100] sm:$0xff] %v1349_v34  ;;  %v1318_v39 = vmax.f32 %v1254_v35, 0.0  ;;  %v1350_v40 = vmax.f32 %v1286_v36, 0.0 }
 0x143   :  { %v733_v37 = vpop.f32.mrb[4].mxu0  ;;  %v861_v38 = vpop.f32.mrb[4].mxu1 }
 0x144   :  { %v735_v41 = vpop.f32.mrb[5].mxu0  ;;  %v863_v42 = vpop.f32.mrb[5].mxu1  ;;  %1382 = vst [vmem:[#allocation7 + $0x8] sm:$0xff] %v1318_v39  ;;  %1414 = vst [vmem:[#allocation7 + $0x108] sm:$0xff] %v1350_v40  ;;  %v1184_v45 = vmul.f32 %v1865_v18, %v733_v37  ;;  %v1216_v46 = vmul.f32 %v1865_v18, %v861_v38 }
 0x145   :  { %v736_v43 = vpop.f32.mrb[6].mxu0  ;;  %v864_v44 = vpop.f32.mrb[6].mxu1 }
 0x146   :  { %v738_v47 = vpop.f32.mrb[7].mxu0  ;;  %v866_v48 = vpop.f32.mrb[7].mxu1  ;;  %v1255_v49 = vadd.f32 %v1870_v22, %v1184_v45  ;;  %v1287_v50 = vadd.f32 %v1870_v22, %v1216_v46  ;;  %v1185_v51 = vmul.f32 %v1865_v18, %v736_v43  ;;  %v1217_v52 = vmul.f32 %v1865_v18, %v864_v44 }
 0x148   :  { %v1319_v53 = vmax.f32 %v1255_v49, 0.0  ;;  %v1351_v54 = vmax.f32 %v1287_v50, 0.0  ;;  %v1256_v55 = vadd.f32 %v1870_v22, %v1185_v51  ;;  %v1288_v56 = vadd.f32 %v1870_v22, %v1217_v52 }
 0x14a   :  { %1383 = vst [vmem:[#allocation7 + $0x10] sm:$0xff] %v1319_v53  ;;  %1415 = vst [vmem:[#allocation7 + $0x110] sm:$0xff] %v1351_v54  ;;  %v1320_v59 = vmax.f32 %v1256_v55, 0.0  ;;  %v1352_v60 = vmax.f32 %v1288_v56, 0.0 }
 0x14b   :  { %v741_v57 = vpop.f32.mrb[8].mxu0  ;;  %v869_v58 = vpop.f32.mrb[8].mxu1 }
 0x14c   :  { %v743_v61 = vpop.f32.mrb[9].mxu0  ;;  %v871_v62 = vpop.f32.mrb[9].mxu1  ;;  %1384 = vst [vmem:[#allocation7 + $0x18] sm:$0xff] %v1320_v59  ;;  %1416 = vst [vmem:[#allocation7 + $0x118] sm:$0xff] %v1352_v60  ;;  %v1186_v1 = vmul.f32 %v1865_v18, %v741_v57  ;;  %v1218_v2 = vmul.f32 %v1865_v18, %v869_v58 }
 0x14d   :  { %v744_v63 = vpop.f32.mrb[10].mxu0  ;;  %v872_v0 = vpop.f32.mrb[10].mxu1 }
 0x14e   :  { %v746_v3 = vpop.f32.mrb[11].mxu0  ;;  %v874_v4 = vpop.f32.mrb[11].mxu1  ;;  %v1257_v5 = vadd.f32 %v1870_v22, %v1186_v1  ;;  %v1289_v6 = vadd.f32 %v1870_v22, %v1218_v2  ;;  %v1187_v7 = vmul.f32 %v1865_v18, %v744_v63  ;;  %v1219_v8 = vmul.f32 %v1865_v18, %v872_v0 }
 0x150   :  { %v1321_v9 = vmax.f32 %v1257_v5, 0.0  ;;  %v1353_v10 = vmax.f32 %v1289_v6, 0.0  ;;  %v1258_v11 = vadd.f32 %v1870_v22, %v1187_v7  ;;  %v1290_v12 = vadd.f32 %v1870_v22, %v1219_v8 }
 0x152   :  { %1385 = vst [vmem:[#allocation7 + $0x20] sm:$0xff] %v1321_v9  ;;  %1417 = vst [vmem:[#allocation7 + $0x120] sm:$0xff] %v1353_v10  ;;  %v1322_v15 = vmax.f32 %v1258_v11, 0.0  ;;  %v1354_v16 = vmax.f32 %v1290_v12, 0.0 }
 0x153   :  { %v749_v13 = vpop.f32.mrb[12].mxu0  ;;  %v877_v14 = vpop.f32.mrb[12].mxu1 }
 0x154   :  { %v751_v17 = vpop.f32.mrb[13].mxu0  ;;  %v879_v19 = vpop.f32.mrb[13].mxu1  ;;  %1386 = vst [vmem:[#allocation7 + $0x28] sm:$0xff] %v1322_v15  ;;  %1418 = vst [vmem:[#allocation7 + $0x128] sm:$0xff] %v1354_v16  ;;  %v1188_v23 = vmul.f32 %v1865_v18, %v749_v13  ;;  %v1220_v24 = vmul.f32 %v1865_v18, %v877_v14 }
 0x155   :  { %v752_v20 = vpop.f32.mrb[14].mxu0  ;;  %v880_v21 = vpop.f32.mrb[14].mxu1 }
 0x156   :  { %v754_v25 = vpop.f32.mrb[15].mxu0  ;;  %v882_v26 = vpop.f32.mrb[15].mxu1  ;;  %v1259_v27 = vadd.f32 %v1870_v22, %v1188_v23  ;;  %v1291_v28 = vadd.f32 %v1870_v22, %v1220_v24  ;;  %v1189_v29 = vmul.f32 %v1865_v18, %v752_v20  ;;  %v1221_v30 = vmul.f32 %v1865_v18, %v880_v21 }
 0x158   :  { %v1323_v31 = vmax.f32 %v1259_v27, 0.0  ;;  %v1355_v32 = vmax.f32 %v1291_v28, 0.0  ;;  %v1260_v33 = vadd.f32 %v1870_v22, %v1189_v29  ;;  %v1292_v34 = vadd.f32 %v1870_v22, %v1221_v30 }
 0x15a   :  { %1387 = vst [vmem:[#allocation7 + $0x30] sm:$0xff] %v1323_v31  ;;  %1419 = vst [vmem:[#allocation7 + $0x130] sm:$0xff] %v1355_v32  ;;  %v1324_v37 = vmax.f32 %v1260_v33, 0.0  ;;  %v1356_v38 = vmax.f32 %v1292_v34, 0.0 }
 0x15b   :  { %v757_v35 = vpop.f32.mrb[16].mxu0  ;;  %v885_v36 = vpop.f32.mrb[16].mxu1 }
 0x15c   :  { %v759_v39 = vpop.f32.mrb[17].mxu0  ;;  %v887_v40 = vpop.f32.mrb[17].mxu1  ;;  %1388 = vst [vmem:[#allocation7 + $0x38] sm:$0xff] %v1324_v37  ;;  %1420 = vst [vmem:[#allocation7 + $0x138] sm:$0xff] %v1356_v38  ;;  %v1190_v43 = vmul.f32 %v1865_v18, %v757_v35  ;;  %v1222_v44 = vmul.f32 %v1865_v18, %v885_v36 }
 0x15d   :  { %v760_v41 = vpop.f32.mrb[18].mxu0  ;;  %v888_v42 = vpop.f32.mrb[18].mxu1 }
 0x15e   :  { %v762_v45 = vpop.f32.mrb[19].mxu0  ;;  %v890_v46 = vpop.f32.mrb[19].mxu1  ;;  %v1261_v47 = vadd.f32 %v1870_v22, %v1190_v43  ;;  %v1293_v48 = vadd.f32 %v1870_v22, %v1222_v44  ;;  %v1191_v49 = vmul.f32 %v1865_v18, %v760_v41  ;;  %v1223_v50 = vmul.f32 %v1865_v18, %v888_v42 }
 0x160   :  { %v1325_v51 = vmax.f32 %v1261_v47, 0.0  ;;  %v1357_v52 = vmax.f32 %v1293_v48, 0.0  ;;  %v1262_v53 = vadd.f32 %v1870_v22, %v1191_v49  ;;  %v1294_v54 = vadd.f32 %v1870_v22, %v1223_v50 }
 0x162   :  { %1389 = vst [vmem:[#allocation7 + $0x40] sm:$0xff] %v1325_v51  ;;  %1421 = vst [vmem:[#allocation7 + $0x140] sm:$0xff] %v1357_v52  ;;  %v1326_v57 = vmax.f32 %v1262_v53, 0.0  ;;  %v1358_v58 = vmax.f32 %v1294_v54, 0.0 }
 0x163   :  { %v765_v55 = vpop.f32.mrb[20].mxu0  ;;  %v893_v56 = vpop.f32.mrb[20].mxu1 }
 0x164   :  { %v767_v59 = vpop.f32.mrb[21].mxu0  ;;  %v895_v60 = vpop.f32.mrb[21].mxu1  ;;  %1390 = vst [vmem:[#allocation7 + $0x48] sm:$0xff] %v1326_v57  ;;  %1422 = vst [vmem:[#allocation7 + $0x148] sm:$0xff] %v1358_v58  ;;  %v1192_v63 = vmul.f32 %v1865_v18, %v765_v55  ;;  %v1224_v0 = vmul.f32 %v1865_v18, %v893_v56 }
 0x165   :  { %v768_v61 = vpop.f32.mrb[22].mxu0  ;;  %v896_v62 = vpop.f32.mrb[22].mxu1 }
 0x166   :  { %v770_v1 = vpop.f32.mrb[23].mxu0  ;;  %v898_v2 = vpop.f32.mrb[23].mxu1  ;;  %v1263_v3 = vadd.f32 %v1870_v22, %v1192_v63  ;;  %v1295_v4 = vadd.f32 %v1870_v22, %v1224_v0  ;;  %v1193_v5 = vmul.f32 %v1865_v18, %v768_v61  ;;  %v1225_v6 = vmul.f32 %v1865_v18, %v896_v62 }
 0x168   :  { %v1327_v7 = vmax.f32 %v1263_v3, 0.0  ;;  %v1359_v8 = vmax.f32 %v1295_v4, 0.0  ;;  %v1264_v9 = vadd.f32 %v1870_v22, %v1193_v5  ;;  %v1296_v10 = vadd.f32 %v1870_v22, %v1225_v6 }
 0x16a   :  { %1391 = vst [vmem:[#allocation7 + $0x50] sm:$0xff] %v1327_v7  ;;  %1423 = vst [vmem:[#allocation7 + $0x150] sm:$0xff] %v1359_v8  ;;  %v1328_v13 = vmax.f32 %v1264_v9, 0.0  ;;  %v1360_v14 = vmax.f32 %v1296_v10, 0.0 }
 0x16b   :  { %v773_v11 = vpop.f32.mrb[24].mxu0  ;;  %v901_v12 = vpop.f32.mrb[24].mxu1 }
 0x16c   :  { %v775_v15 = vpop.f32.mrb[25].mxu0  ;;  %v903_v16 = vpop.f32.mrb[25].mxu1  ;;  %1392 = vst [vmem:[#allocation7 + $0x58] sm:$0xff] %v1328_v13  ;;  %1424 = vst [vmem:[#allocation7 + $0x158] sm:$0xff] %v1360_v14  ;;  %v1194_v20 = vmul.f32 %v1865_v18, %v773_v11  ;;  %v1226_v21 = vmul.f32 %v1865_v18, %v901_v12 }
 0x16d   :  { %v776_v17 = vpop.f32.mrb[26].mxu0  ;;  %v904_v19 = vpop.f32.mrb[26].mxu1 }
 0x16e   :  { %v778_v23 = vpop.f32.mrb[27].mxu0  ;;  %v906_v24 = vpop.f32.mrb[27].mxu1  ;;  %v1265_v25 = vadd.f32 %v1870_v22, %v1194_v20  ;;  %v1297_v26 = vadd.f32 %v1870_v22, %v1226_v21  ;;  %v1195_v27 = vmul.f32 %v1865_v18, %v776_v17  ;;  %v1227_v28 = vmul.f32 %v1865_v18, %v904_v19 }
 0x170   :  { %v1329_v29 = vmax.f32 %v1265_v25, 0.0  ;;  %v1361_v30 = vmax.f32 %v1297_v26, 0.0  ;;  %v1266_v31 = vadd.f32 %v1870_v22, %v1195_v27  ;;  %v1298_v32 = vadd.f32 %v1870_v22, %v1227_v28 }
 0x172   :  { %1393 = vst [vmem:[#allocation7 + $0x60] sm:$0xff] %v1329_v29  ;;  %1425 = vst [vmem:[#allocation7 + $0x160] sm:$0xff] %v1361_v30  ;;  %v1330_v35 = vmax.f32 %v1266_v31, 0.0  ;;  %v1362_v36 = vmax.f32 %v1298_v32, 0.0 }
 0x173   :  { %v781_v33 = vpop.f32.mrb[28].mxu0  ;;  %v909_v34 = vpop.f32.mrb[28].mxu1 }
 0x174   :  { %v783_v37 = vpop.f32.mrb[29].mxu0  ;;  %v911_v38 = vpop.f32.mrb[29].mxu1  ;;  %1394 = vst [vmem:[#allocation7 + $0x68] sm:$0xff] %v1330_v35  ;;  %1426 = vst [vmem:[#allocation7 + $0x168] sm:$0xff] %v1362_v36  ;;  %v1196_v41 = vmul.f32 %v1865_v18, %v781_v33  ;;  %v1228_v42 = vmul.f32 %v1865_v18, %v909_v34 }
 0x175   :  { %v784_v39 = vpop.f32.mrb[30].mxu0  ;;  %v912_v40 = vpop.f32.mrb[30].mxu1 }
 0x176   :  { %v786_v43 = vpop.f32.mrb[31].mxu0  ;;  %v914_v44 = vpop.f32.mrb[31].mxu1  ;;  %v1267_v45 = vadd.f32 %v1870_v22, %v1196_v41  ;;  %v1299_v46 = vadd.f32 %v1870_v22, %v1228_v42  ;;  %v1197_v47 = vmul.f32 %v1865_v18, %v784_v39  ;;  %v1229_v48 = vmul.f32 %v1865_v18, %v912_v40 }
 0x178   :  { %v1331_v49 = vmax.f32 %v1267_v45, 0.0  ;;  %v1363_v50 = vmax.f32 %v1299_v46, 0.0  ;;  %v1268_v51 = vadd.f32 %v1870_v22, %v1197_v47  ;;  %v1300_v52 = vadd.f32 %v1870_v22, %v1229_v48 }
 0x17a   :  { %1395 = vst [vmem:[#allocation7 + $0x70] sm:$0xff] %v1331_v49  ;;  %1427 = vst [vmem:[#allocation7 + $0x170] sm:$0xff] %v1363_v50  ;;  %v1332_v55 = vmax.f32 %v1268_v51, 0.0  ;;  %v1364_v56 = vmax.f32 %v1300_v52, 0.0 }
 0x17b   :  { %v789_v53 = vpop.f32.mrb[32].mxu0  ;;  %v917_v54 = vpop.f32.mrb[32].mxu1 }
 0x17c   :  { %v791_v57 = vpop.f32.mrb[33].mxu0  ;;  %v919_v58 = vpop.f32.mrb[33].mxu1  ;;  %1396 = vst [vmem:[#allocation7 + $0x78] sm:$0xff] %v1332_v55  ;;  %1428 = vst [vmem:[#allocation7 + $0x178] sm:$0xff] %v1364_v56  ;;  %v1198_v61 = vmul.f32 %v1865_v18, %v789_v53  ;;  %v1230_v62 = vmul.f32 %v1865_v18, %v917_v54 }
 0x17d   :  { %v792_v59 = vpop.f32.mrb[34].mxu0  ;;  %v920_v60 = vpop.f32.mrb[34].mxu1 }
 0x17e   :  { %v794_v63 = vpop.f32.mrb[35].mxu0  ;;  %v922_v0 = vpop.f32.mrb[35].mxu1  ;;  %v1269_v1 = vadd.f32 %v1870_v22, %v1198_v61  ;;  %v1301_v2 = vadd.f32 %v1870_v22, %v1230_v62  ;;  %v1199_v3 = vmul.f32 %v1865_v18, %v792_v59  ;;  %v1231_v4 = vmul.f32 %v1865_v18, %v920_v60 }
 0x180   :  { %v1333_v5 = vmax.f32 %v1269_v1, 0.0  ;;  %v1365_v6 = vmax.f32 %v1301_v2, 0.0  ;;  %v1270_v7 = vadd.f32 %v1870_v22, %v1199_v3  ;;  %v1302_v8 = vadd.f32 %v1870_v22, %v1231_v4 }
 0x182   :  { %1397 = vst [vmem:[#allocation7 + $0x80] sm:$0xff] %v1333_v5  ;;  %1429 = vst [vmem:[#allocation7 + $0x180] sm:$0xff] %v1365_v6  ;;  %v1334_v11 = vmax.f32 %v1270_v7, 0.0  ;;  %v1366_v12 = vmax.f32 %v1302_v8, 0.0 }
 0x183   :  { %v797_v9 = vpop.f32.mrb[36].mxu0  ;;  %v925_v10 = vpop.f32.mrb[36].mxu1 }
 0x184   :  { %v799_v13 = vpop.f32.mrb[37].mxu0  ;;  %v927_v14 = vpop.f32.mrb[37].mxu1  ;;  %1398 = vst [vmem:[#allocation7 + $0x88] sm:$0xff] %v1334_v11  ;;  %1430 = vst [vmem:[#allocation7 + $0x188] sm:$0xff] %v1366_v12  ;;  %v1200_v17 = vmul.f32 %v1865_v18, %v797_v9  ;;  %v1232_v19 = vmul.f32 %v1865_v18, %v925_v10 }
 0x185   :  { %v800_v15 = vpop.f32.mrb[38].mxu0  ;;  %v928_v16 = vpop.f32.mrb[38].mxu1 }
 0x186   :  { %v802_v20 = vpop.f32.mrb[39].mxu0  ;;  %v930_v21 = vpop.f32.mrb[39].mxu1  ;;  %v1271_v23 = vadd.f32 %v1870_v22, %v1200_v17  ;;  %v1303_v24 = vadd.f32 %v1870_v22, %v1232_v19  ;;  %v1201_v25 = vmul.f32 %v1865_v18, %v800_v15  ;;  %v1233_v26 = vmul.f32 %v1865_v18, %v928_v16 }
 0x188   :  { %v1335_v27 = vmax.f32 %v1271_v23, 0.0  ;;  %v1367_v28 = vmax.f32 %v1303_v24, 0.0  ;;  %v1272_v29 = vadd.f32 %v1870_v22, %v1201_v25  ;;  %v1304_v30 = vadd.f32 %v1870_v22, %v1233_v26 }
 0x18a   :  { %1399 = vst [vmem:[#allocation7 + $0x90] sm:$0xff] %v1335_v27  ;;  %1431 = vst [vmem:[#allocation7 + $0x190] sm:$0xff] %v1367_v28  ;;  %v1336_v33 = vmax.f32 %v1272_v29, 0.0  ;;  %v1368_v34 = vmax.f32 %v1304_v30, 0.0 }
 0x18b   :  { %v805_v31 = vpop.f32.mrb[40].mxu0  ;;  %v933_v32 = vpop.f32.mrb[40].mxu1 }
 0x18c   :  { %v807_v35 = vpop.f32.mrb[41].mxu0  ;;  %v935_v36 = vpop.f32.mrb[41].mxu1  ;;  %1400 = vst [vmem:[#allocation7 + $0x98] sm:$0xff] %v1336_v33  ;;  %1432 = vst [vmem:[#allocation7 + $0x198] sm:$0xff] %v1368_v34  ;;  %v1202_v39 = vmul.f32 %v1865_v18, %v805_v31  ;;  %v1234_v40 = vmul.f32 %v1865_v18, %v933_v32 }
 0x18d   :  { %v808_v37 = vpop.f32.mrb[42].mxu0  ;;  %v936_v38 = vpop.f32.mrb[42].mxu1 }
 0x18e   :  { %v810_v41 = vpop.f32.mrb[43].mxu0  ;;  %v938_v42 = vpop.f32.mrb[43].mxu1  ;;  %v1273_v43 = vadd.f32 %v1870_v22, %v1202_v39  ;;  %v1305_v44 = vadd.f32 %v1870_v22, %v1234_v40  ;;  %v1203_v45 = vmul.f32 %v1865_v18, %v808_v37  ;;  %v1235_v46 = vmul.f32 %v1865_v18, %v936_v38 }
 0x190   :  { %v1337_v47 = vmax.f32 %v1273_v43, 0.0  ;;  %v1369_v48 = vmax.f32 %v1305_v44, 0.0  ;;  %v1274_v49 = vadd.f32 %v1870_v22, %v1203_v45  ;;  %v1306_v50 = vadd.f32 %v1870_v22, %v1235_v46 }
 0x192   :  { %1401 = vst [vmem:[#allocation7 + $0xa0] sm:$0xff] %v1337_v47  ;;  %1433 = vst [vmem:[#allocation7 + $0x1a0] sm:$0xff] %v1369_v48  ;;  %v1338_v53 = vmax.f32 %v1274_v49, 0.0  ;;  %v1370_v54 = vmax.f32 %v1306_v50, 0.0 }
 0x193   :  { %v813_v51 = vpop.f32.mrb[44].mxu0  ;;  %v941_v52 = vpop.f32.mrb[44].mxu1 }
 0x194   :  { %v815_v55 = vpop.f32.mrb[45].mxu0  ;;  %v943_v56 = vpop.f32.mrb[45].mxu1  ;;  %1402 = vst [vmem:[#allocation7 + $0xa8] sm:$0xff] %v1338_v53  ;;  %1434 = vst [vmem:[#allocation7 + $0x1a8] sm:$0xff] %v1370_v54  ;;  %v1204_v59 = vmul.f32 %v1865_v18, %v813_v51  ;;  %v1236_v60 = vmul.f32 %v1865_v18, %v941_v52 }
 0x195   :  { %v816_v57 = vpop.f32.mrb[46].mxu0  ;;  %v944_v58 = vpop.f32.mrb[46].mxu1 }
 0x196   :  { %v818_v61 = vpop.f32.mrb[47].mxu0  ;;  %v946_v62 = vpop.f32.mrb[47].mxu1  ;;  %v1275_v63 = vadd.f32 %v1870_v22, %v1204_v59  ;;  %v1307_v0 = vadd.f32 %v1870_v22, %v1236_v60  ;;  %v1205_v1 = vmul.f32 %v1865_v18, %v816_v57  ;;  %v1237_v2 = vmul.f32 %v1865_v18, %v944_v58 }
 0x198   :  { %v1339_v3 = vmax.f32 %v1275_v63, 0.0  ;;  %v1371_v4 = vmax.f32 %v1307_v0, 0.0  ;;  %v1276_v5 = vadd.f32 %v1870_v22, %v1205_v1  ;;  %v1308_v6 = vadd.f32 %v1870_v22, %v1237_v2 }
 0x19a   :  { %1403 = vst [vmem:[#allocation7 + $0xb0] sm:$0xff] %v1339_v3  ;;  %1435 = vst [vmem:[#allocation7 + $0x1b0] sm:$0xff] %v1371_v4  ;;  %v1340_v9 = vmax.f32 %v1276_v5, 0.0  ;;  %v1372_v10 = vmax.f32 %v1308_v6, 0.0 }
 0x19b   :  { %v821_v7 = vpop.f32.mrb[48].mxu0  ;;  %v949_v8 = vpop.f32.mrb[48].mxu1 }
 0x19c   :  { %v823_v11 = vpop.f32.mrb[49].mxu0  ;;  %v951_v12 = vpop.f32.mrb[49].mxu1  ;;  %1404 = vst [vmem:[#allocation7 + $0xb8] sm:$0xff] %v1340_v9  ;;  %1436 = vst [vmem:[#allocation7 + $0x1b8] sm:$0xff] %v1372_v10  ;;  %v1206_v15 = vmul.f32 %v1865_v18, %v821_v7  ;;  %v1238_v16 = vmul.f32 %v1865_v18, %v949_v8 }
 0x19d   :  { %v824_v13 = vpop.f32.mrb[50].mxu0  ;;  %v952_v14 = vpop.f32.mrb[50].mxu1 }
 0x19e   :  { %v826_v17 = vpop.f32.mrb[51].mxu0  ;;  %v954_v19 = vpop.f32.mrb[51].mxu1  ;;  %v1277_v20 = vadd.f32 %v1870_v22, %v1206_v15  ;;  %v1309_v21 = vadd.f32 %v1870_v22, %v1238_v16  ;;  %v1207_v23 = vmul.f32 %v1865_v18, %v824_v13  ;;  %v1239_v24 = vmul.f32 %v1865_v18, %v952_v14 }
 0x1a0   :  { %v1341_v25 = vmax.f32 %v1277_v20, 0.0  ;;  %v1373_v26 = vmax.f32 %v1309_v21, 0.0  ;;  %v1278_v27 = vadd.f32 %v1870_v22, %v1207_v23  ;;  %v1310_v28 = vadd.f32 %v1870_v22, %v1239_v24 }
 0x1a2   :  { %1405 = vst [vmem:[#allocation7 + $0xc0] sm:$0xff] %v1341_v25  ;;  %1437 = vst [vmem:[#allocation7 + $0x1c0] sm:$0xff] %v1373_v26  ;;  %v1342_v31 = vmax.f32 %v1278_v27, 0.0  ;;  %v1374_v32 = vmax.f32 %v1310_v28, 0.0 }
 0x1a3   :  { %v829_v29 = vpop.f32.mrb[52].mxu0  ;;  %v957_v30 = vpop.f32.mrb[52].mxu1 }
 0x1a4   :  { %v831_v33 = vpop.f32.mrb[53].mxu0  ;;  %v959_v34 = vpop.f32.mrb[53].mxu1  ;;  %1406 = vst [vmem:[#allocation7 + $0xc8] sm:$0xff] %v1342_v31  ;;  %1438 = vst [vmem:[#allocation7 + $0x1c8] sm:$0xff] %v1374_v32  ;;  %v1208_v37 = vmul.f32 %v1865_v18, %v829_v29  ;;  %v1240_v38 = vmul.f32 %v1865_v18, %v957_v30 }
 0x1a5   :  { %v832_v35 = vpop.f32.mrb[54].mxu0  ;;  %v960_v36 = vpop.f32.mrb[54].mxu1 }
 0x1a6   :  { %v834_v39 = vpop.f32.mrb[55].mxu0  ;;  %v962_v40 = vpop.f32.mrb[55].mxu1  ;;  %v1279_v41 = vadd.f32 %v1870_v22, %v1208_v37  ;;  %v1311_v42 = vadd.f32 %v1870_v22, %v1240_v38  ;;  %v1209_v43 = vmul.f32 %v1865_v18, %v832_v35  ;;  %v1241_v44 = vmul.f32 %v1865_v18, %v960_v36 }
 0x1a8   :  { %v1343_v45 = vmax.f32 %v1279_v41, 0.0  ;;  %v1375_v46 = vmax.f32 %v1311_v42, 0.0  ;;  %v1280_v47 = vadd.f32 %v1870_v22, %v1209_v43  ;;  %v1312_v48 = vadd.f32 %v1870_v22, %v1241_v44 }
 0x1aa   :  { %1407 = vst [vmem:[#allocation7 + $0xd0] sm:$0xff] %v1343_v45  ;;  %1439 = vst [vmem:[#allocation7 + $0x1d0] sm:$0xff] %v1375_v46  ;;  %v1344_v51 = vmax.f32 %v1280_v47, 0.0  ;;  %v1376_v52 = vmax.f32 %v1312_v48, 0.0 }
 0x1ab   :  { %v837_v49 = vpop.f32.mrb[56].mxu0  ;;  %v965_v50 = vpop.f32.mrb[56].mxu1 }
 0x1ac   :  { %v839_v53 = vpop.f32.mrb[57].mxu0  ;;  %v967_v54 = vpop.f32.mrb[57].mxu1  ;;  %1408 = vst [vmem:[#allocation7 + $0xd8] sm:$0xff] %v1344_v51  ;;  %1440 = vst [vmem:[#allocation7 + $0x1d8] sm:$0xff] %v1376_v52  ;;  %v1210_v57 = vmul.f32 %v1865_v18, %v837_v49  ;;  %v1242_v58 = vmul.f32 %v1865_v18, %v965_v50 }
 0x1ad   :  { %v840_v55 = vpop.f32.mrb[58].mxu0  ;;  %v968_v56 = vpop.f32.mrb[58].mxu1 }
 0x1ae   :  { %v842_v59 = vpop.f32.mrb[59].mxu0  ;;  %v970_v60 = vpop.f32.mrb[59].mxu1  ;;  %v1281_v61 = vadd.f32 %v1870_v22, %v1210_v57  ;;  %v1313_v62 = vadd.f32 %v1870_v22, %v1242_v58  ;;  %v1211_v63 = vmul.f32 %v1865_v18, %v840_v55  ;;  %v1243_v0 = vmul.f32 %v1865_v18, %v968_v56 }
 0x1b0   :  { %v1345_v1 = vmax.f32 %v1281_v61, 0.0  ;;  %v1377_v2 = vmax.f32 %v1313_v62, 0.0  ;;  %v1282_v3 = vadd.f32 %v1870_v22, %v1211_v63  ;;  %v1314_v4 = vadd.f32 %v1870_v22, %v1243_v0 }
 0x1b2   :  { %1409 = vst [vmem:[#allocation7 + $0xe0] sm:$0xff] %v1345_v1  ;;  %1441 = vst [vmem:[#allocation7 + $0x1e0] sm:$0xff] %v1377_v2  ;;  %v1346_v7 = vmax.f32 %v1282_v3, 0.0  ;;  %v1378_v8 = vmax.f32 %v1314_v4, 0.0 }
 0x1b3   :  { %v845_v5 = vpop.f32.mrb[60].mxu0  ;;  %v973_v6 = vpop.f32.mrb[60].mxu1 }
 0x1b4   :  { %v847_v9 = vpop.f32.mrb[61].mxu0  ;;  %v975_v10 = vpop.f32.mrb[61].mxu1  ;;  %1410 = vst [vmem:[#allocation7 + $0xe8] sm:$0xff] %v1346_v7  ;;  %1442 = vst [vmem:[#allocation7 + $0x1e8] sm:$0xff] %v1378_v8  ;;  %v1212_v13 = vmul.f32 %v1865_v18, %v845_v5  ;;  %v1244_v14 = vmul.f32 %v1865_v18, %v973_v6 }
 0x1b5   :  { %v848_v11 = vpop.f32.mrb[62].mxu0  ;;  %v976_v12 = vpop.f32.mrb[62].mxu1 }
 0x1b6   :  { %v850_v15 = vpop.f32.mrb[63].mxu0  ;;  %v978_v16 = vpop.f32.mrb[63].mxu1  ;;  %v1283_v17 = vadd.f32 %v1870_v22, %v1212_v13  ;;  %v1315_v19 = vadd.f32 %v1870_v22, %v1244_v14  ;;  %v1213_v20 = vmul.f32 %v1865_v18, %v848_v11  ;;  %v1245_v21 = vmul.f32 %v1865_v18, %v976_v12 }
 0x1b8   :  { %v1347_v23 = vmax.f32 %v1283_v17, 0.0  ;;  %v1379_v24 = vmax.f32 %v1315_v19, 0.0  ;;  %v1284_v25 = vadd.f32 %v1870_v22, %v1213_v20  ;;  %v1316_v26 = vadd.f32 %v1870_v22, %v1245_v21 }
 0x1ba   :  { %1411 = vst [vmem:[#allocation7 + $0xf0] sm:$0xff] %v1347_v23  ;;  %1443 = vst [vmem:[#allocation7 + $0x1f0] sm:$0xff] %v1379_v24  ;;  %v1348_v27 = vmax.f32 %v1284_v25, 0.0  ;;  %v1380_v28 = vmax.f32 %v1316_v26, 0.0 }
 0x1bc   :  { %1412 = vst [vmem:[#allocation7 + $0xf8] sm:$0xff] %v1348_v27  ;;  %1444 = vst [vmem:[#allocation7 + $0x1f8] sm:$0xff] %v1380_v28 }
 0x1bd   :  { %1753 = shalt.err (!%p1750_p6)
}
 0x1be   :  { %s1754_s22 = scalar_lea.hbm %s2019_s4, 8192 }
 0x1bf   :  { %p1755_p7 = scmp.ne.s32.totalorder %s2019_s4, %s1754_s22  ;;  %p1758_p8 = scmp.lt.u32.totalorder %s1754_s22, %s2019_s4 }
 0x1c1   :  { %p1760_p9 = pnand %p1758_p8, %p1755_p7 }
 0x1c3   :  { %1763 = shalt.err (!%p1760_p9)
}
 0x1c4   :  { %1456 = dma.vmem_to_hbm [thread:$0]  %s1451_s3, 8192, %s2019_s4, [#allocation4], %s1771_s25, %s1771_s25, %s1772_s26  }
 0x1c5   :  { %1768 = dma.done.wait [#allocation4], 8192  }
 0x1c6   :  { %1769 = vsyncadd [#allocation4], 4294959104 }
 0x1c7   :  { %1460 = vsyncpa [#allocation3], 1 }
 0x1c8   :  { %1461 = vsyncpa [#allocation6], 1 }
 0x1c9   :  { %1462 = vsyncpa [#allocation4], 1 }

</bundles_post_ra>
